<compile_context>
chip_gen: v7x
topology: tpu7x:2x2x1
jax: 0.10.0
libtpu: 0.0.40
codegen_flags: <defaults>
</compile_context>

<pallas_src>
import numpy as np

import jax
import jax.numpy as jnp
from jax import lax
from jax.experimental import pallas as pl
from jax.experimental.pallas import tpu as pltpu


# ----------------------------------------------------------------------------
# Kernel
# ----------------------------------------------------------------------------
def _mppi_kernel(scal_ref, noise_ref, mean_ref, umin_ref, umax_ref,
                 r_ref, lamv_ref, g_ref, x0_ref, qw_ref,
                 opt_act_ref, opt_state_ref, weights_ref):
    """Whole-array VMEM blocks; scal_ref = [lambda, 1/lambda, stage_cost(x0)] in SMEM.

    Layout: the sample axis N is the 128-lane (minor) dimension everywhere;
    the flattened time*control / time*state axes live on sublanes.
    """
    inv_lam = scal_ref[1]          # 1 / lambda
    c0 = scal_ref[2]               # sum(x0^2 * q): constant over samples

    # Perturbed + clamped action sequences, all samples / timesteps: (H*C, N).
    pert = jnp.clip(mean_ref[...] + noise_ref[...], umin_ref[...], umax_ref[...])

    # Control-dependent cost (r stage cost + lambda * action cost), all t fused
    # into one sublane reduction -> lane-dense (1, N).
    cost = jnp.sum(pert * (pert * r_ref[...] + lamv_ref[...]),
                   axis=0, keepdims=True)

    # Lifted dynamics: states x_1..x_H for every sample in ONE MXU matmul.
    states = jnp.dot(g_ref[...], pert,
                     preferred_element_type=jnp.float32) + x0_ref[...]      # (H*S, N)

    # State stage costs (t = 1..H-1) + terminal cost (t = H) in one reduction.
    cost = cost + jnp.sum(states * states * qw_ref[...],
                          axis=0, keepdims=True) + c0                       # (1, N)

    # softmax(-cost / lambda) over samples, fully lane-dense.
    z = -cost * inv_lam
    z = z - jnp.max(z, axis=-1, keepdims=True)
    e = jnp.exp(z)
    # approx=True (EUP vrcp) would be cheaper; kept exact for the tight check.
    w = e * pl.reciprocal(jnp.sum(e, axis=-1, keepdims=True), approx=False)
    weights_ref[...] = w                                                    # (1, N)

    # Weighted action average as an MXU contraction over the sample axis.
    opt_act = lax.dot_general(pert, w, (((1,), (1,)), ((), ())),
                              preferred_element_type=jnp.float32)           # (H*C, 1)
    opt_act_ref[...] = opt_act

    # Optimal rollout reuses the lifted dynamics matrix: one tiny matmul.
    opt_state_ref[...] = jnp.dot(g_ref[...], opt_act,
                                 preferred_element_type=jnp.float32) + x0_ref[...]


# ----------------------------------------------------------------------------
# Host-side (once-per-problem) constants of the lifted formulation, float64.
#   x_t = x0 @ A^t + sum_{k<t} u_k @ B @ A^(t-1-k)   with A := a_t_mat, B := b_t_mat
# ----------------------------------------------------------------------------
def build_mppi_constants(a_t_mat, b_t_mat, q, r, qf, u_min, u_max, horizon):
    a = np.asarray(a_t_mat, np.float64)
    b = np.asarray(b_t_mat, np.float64)
    S, C, H = a.shape[0], b.shape[0], horizon

    powers = [np.eye(S)]
    for _ in range(H):
        powers.append(powers[-1] @ a)                       # A^0 .. A^H

    G = np.zeros((H * C, H * S))                            # block (k, t-1) = B @ A^(t-1-k)
    for t in range(1, H + 1):
        for k in range(t):
            G[k * C:(k + 1) * C, (t - 1) * S:t * S] = b @ powers[t - 1 - k]

    a_pow_cat = np.concatenate([powers[t] for t in range(1, H + 1)], axis=1)   # (S, H*S)
    qw = np.concatenate([np.tile(np.asarray(q, np.float64), H - 1),
                         np.asarray(qf, np.float64)])                          # (H*S,)
    return dict(
        GT=np.ascontiguousarray(G.T),                       # (H*S, H*C)
        a_pow_cat=a_pow_cat,
        qw=qw,
        r_tiled=np.tile(np.asarray(r, np.float64), H),
        umin_tiled=np.tile(np.asarray(u_min, np.float64), H),
        umax_tiled=np.tile(np.asarray(u_max, np.float64), H),
    )


# ----------------------------------------------------------------------------
# Wrapper
# ----------------------------------------------------------------------------
@jax.jit
def mppi_forward(state, mean_action_seq, noise_hcn, gt, a_pow_cat, qw_col,
                 r_col, umin_col, umax_col, inv_cov, q, lambda_):
    """state:(S,), mean:(H,C), noise:(H,C,N).  Returns (H,C), (1,H+1,S), (N,)."""
    f32 = jnp.float32
    H, C, N = noise_hcn.shape
    S = state.shape[0]
    HC, HS = H * C, H * S

    state = state.astype(f32)
    mean = mean_action_seq.astype(f32)

    # Layout plumbing only (free reshapes, no device transposes).
    noise_t = noise_hcn.reshape(HC, N).astype(f32)                   # (H*C, N)
    mean_col = mean.reshape(HC, 1)
    lamv_col = (lambda_ * (mean @ inv_cov.astype(f32))).reshape(HC, 1)   # hoisted action-cost proj.
    x0_col = (state @ a_pow_cat).reshape(HS, 1)                      # x0 @ A^t, t=1..H
    c0 = jnp.sum(state * state * q.astype(f32))                      # x0 stage cost (constant)

    lam = jnp.asarray(lambda_, f32)
    scal = jnp.stack([lam, 1.0 / lam, c0.astype(f32)])               # SMEM scalars

    # Scoped-VMEM limit sized from the live buffers (with margin), 16..48 MiB.
    live_bytes = 4 * (2 * HC * N + HS * N + HS * HC + 8 * HC + 4 * HS + 4 * N)
    vmem_limit = int(min(max(2 * live_bytes + (2 << 20), 16 << 20), 48 << 20))

    vmem = lambda: pl.BlockSpec(memory_space=pltpu.MemorySpace.VMEM)
    smem = pl.BlockSpec(memory_space=pltpu.MemorySpace.SMEM)

    opt_act_col, opt_state_col, weights_row = pl.pallas_call(
        _mppi_kernel,
        out_shape=(jax.ShapeDtypeStruct((HC, 1), f32),
                   jax.ShapeDtypeStruct((HS, 1), f32),
                   jax.ShapeDtypeStruct((1, N), f32)),
        in_specs=[smem] + [vmem() for _ in range(9)],
        out_specs=(vmem(), vmem(), vmem()),
        compiler_params=pltpu.CompilerParams(vmem_limit_bytes=vmem_limit),
    )(scal, noise_t, mean_col, umin_col, umax_col, r_col, lamv_col,
      gt, x0_col, qw_col)

    opt_act = opt_act_col.reshape(H, C)
    opt_state = jnp.concatenate([state.reshape(1, S),
                                 opt_state_col.reshape(H, S)], axis=0)[None]
    return opt_act, opt_state, weights_row.reshape(N)


# ----------------------------------------------------------------------------
# References
# ----------------------------------------------------------------------------
def mppi_reference_jax(state, mean, noise_hcn, gt, a_pow_cat, qw_col,
                       r_col, umin_col, umax_col, inv_cov, q, lambda_):
    """Plain-JAX (non-Pallas) implementation of the same lifted formulation."""
    f32 = jnp.float32
    H, C, N = noise_hcn.shape
    S = state.shape[0]
    state, mean = state.astype(f32), mean.astype(f32)
    noise_t = noise_hcn.reshape(H * C, N).astype(f32)
    pert = jnp.clip(mean.reshape(H * C, 1) + noise_t, umin_col, umax_col)
    lamv_col = (lambda_ * (mean @ inv_cov.astype(f32))).reshape(H * C, 1)
    x0_col = (state @ a_pow_cat).reshape(H * S, 1)
    cost = jnp.sum(pert * (pert * r_col + lamv_col), axis=0)
    states = gt @ pert + x0_col
    cost = cost + jnp.sum(states * states * qw_col, axis=0) + jnp.sum(state * state * q)
    w = jax.nn.softmax(-cost / lambda_)
    opt_act_col = pert @ w
    opt_state_col = gt @ opt_act_col + x0_col[:, 0]
    opt_state = jnp.concatenate([state.reshape(1, S),
                                 opt_state_col.reshape(H, S)], axis=0)[None]
    return opt_act_col.reshape(H, C), opt_state, w


def mppi_reference_numpy(state, mean, noise_nhc, u_min, u_max,
                         a_t, b_t, inv_cov, q, r, qf, lam):
    """Float64 iterative reference mirroring the PyTorch MPPI.forward exactly."""
    state = np.asarray(state, np.float64); mean = np.asarray(mean, np.float64)
    noise = np.asarray(noise_nhc, np.float64)
    a = np.asarray(a_t, np.float64); b = np.asarray(b_t, np.float64)
    u_min = np.asarray(u_min, np.float64); u_max = np.asarray(u_max, np.float64)
    q = np.asarray(q, np.float64); r = np.asarray(r, np.float64)
    qf = np.asarray(qf, np.float64); inv_cov = np.asarray(inv_cov, np.float64)
    N, H, C = noise.shape; S = state.shape[0]

    pert = np.clip(mean[None] + noise, u_min, u_max)
    states = np.zeros((N, H + 1, S)); states[:, 0] = state
    for t in range(H):
        states[:, t + 1] = states[:, t] @ a + pert[:, t] @ b
    cost = np.zeros(N)
    for t in range(H):
        cost += np.sum(states[:, t] ** 2 * q, -1) + np.sum(pert[:, t] ** 2 * r, -1)
        cost += lam * (pert[:, t] @ (mean[t] @ inv_cov))
    cost += np.sum(states[:, H] ** 2 * qf, -1)
    z = -cost / lam; z -= z.max(); w = np.exp(z); w /= w.sum()
    opt_act = np.einsum('n,nhc->hc', w, pert)
    opt_states = np.zeros((H + 1, S)); opt_states[0] = state
    for t in range(H):
        opt_states[t + 1] = opt_states[t] @ a + opt_act[t] @ b
    return opt_act, opt_states[None], w


def mppi_lifted_numpy(state, mean, noise_hcn, consts, inv_cov, q, lam):
    """Float64 lifted formulation (same math the kernel uses)."""
    state = np.asarray(state, np.float64); mean = np.asarray(mean, np.float64)
    H, C = mean.shape; S = state.shape[0]
    noise_t = np.asarray(noise_hcn, np.float64).reshape(H * C, -1)
    pert = np.clip(mean.reshape(-1, 1) + noise_t,
                   consts["umin_tiled"][:, None], consts["umax_tiled"][:, None])
    lamv = (lam * (mean @ np.asarray(inv_cov, np.float64))).reshape(-1, 1)
    cost = np.sum(pert * (pert * consts["r_tiled"][:, None] + lamv), axis=0)
    x0_row = state @ consts["a_pow_cat"]
    states = consts["GT"] @ pert + x0_row[:, None]
    cost = cost + np.sum(states * states * consts["qw"][:, None], axis=0) \
                + np.sum(state ** 2 * np.asarray(q, np.float64))
    z = -cost / lam; z -= z.max(); w = np.exp(z); w /= w.sum()
    opt_act_col = pert @ w
    opt_state = np.concatenate([state[None],
                                (consts["GT"] @ opt_act_col + x0_row).reshape(H, S)],
                               axis=0)[None]
    return opt_act_col.reshape(H, C), opt_state, w


# ----------------------------------------------------------------------------
if __name__ == "__main__":
    H, N, S, C = 8, 128, 4, 2
    lambda_ = 1.0
    f32 = jnp.float32

    key = jax.random.PRNGKey(0)
    k_noise, k_state, k_mean = jax.random.split(key, 3)

    sigmas = jnp.array([0.5, 0.3], f32)
    u_min = jnp.array([-1.0, -1.0], f32)
    u_max = jnp.array([1.0, 1.0], f32)
    inv_cov = jnp.diag(1.0 / sigmas ** 2)

    a_t_mat = 0.95 * jnp.eye(S, dtype=f32) + 0.02 * jnp.ones((S, S), f32)
    b_t_mat = jnp.array([[0.10, 0.00, 0.05, 0.00],
                         [0.00, 0.10, 0.00, 0.05]], f32)        # (C, S)
    q = jnp.array([1.0, 0.5, 1.0, 0.5], f32)
    r = jnp.array([0.01, 0.01], f32)
    qf = 5.0 * q

    # Noise sampled directly in (H, C, N): the kernel layout is a free reshape.
    noise_hcn = jax.random.normal(k_noise, (H, C, N), f32) * sigmas[None, :, None]
    mean_action_seq = 0.15 * jax.random.normal(k_mean, (H, C), f32)   # nonzero: exercises action cost
    state = 0.8 * jax.random.normal(k_state, (S,), f32)

    # Host-side constants (built once; depend only on static shapes + dynamics).
    consts64 = build_mppi_constants(np.asarray(a_t_mat), np.asarray(b_t_mat),
                                    np.asarray(q), np.asarray(r), np.asarray(qf),
                                    np.asarray(u_min), np.asarray(u_max), H)
    gt        = jnp.asarray(consts64["GT"], f32)
    a_pow_cat = jnp.asarray(consts64["a_pow_cat"], f32)
    qw_col    = jnp.asarray(consts64["qw"], f32).reshape(H * S, 1)
    r_col     = jnp.asarray(consts64["r_tiled"], f32).reshape(H * C, 1)
    umin_col  = jnp.asarray(consts64["umin_tiled"], f32).reshape(H * C, 1)
    umax_col  = jnp.asarray(consts64["umax_tiled"], f32).reshape(H * C, 1)

    opt_act, opt_state, weights = mppi_forward(
        state, mean_action_seq, noise_hcn, gt, a_pow_cat, qw_col,
        r_col, umin_col, umax_col, inv_cov, q, lambda_)
    jax.block_until_ready((opt_act, opt_state, weights))

    # Check 1 (exact math, host float64): lifted formulation == original
    # iterative MPPI forward (mirrors the PyTorch module).
    noise_nhc = np.transpose(np.asarray(noise_hcn, np.float64), (2, 0, 1))
    it_act, it_state, it_w = mppi_reference_numpy(
        state, mean_action_seq, noise_nhc, u_min, u_max,
        a_t_mat, b_t_mat, inv_cov, q, r, qf, lambda_)
    lf_act, lf_state, lf_w = mppi_lifted_numpy(
        state, mean_action_seq, noise_hcn, consts64, inv_cov, q, lambda_)
    assert np.allclose(lf_act, it_act, atol=1e-9, rtol=1e-7)
    assert np.allclose(lf_state, it_state, atol=1e-9, rtol=1e-7)
    assert np.allclose(lf_w, it_w, atol=1e-9, rtol=1e-7)

    # Check 2 (device): Pallas kernel vs plain-JAX lifted reference (same f32
    # operands and formulation, default matmul precision on both sides).
    jx_act, jx_state, jx_w = mppi_reference_jax(
        state, mean_action_seq, noise_hcn, gt, a_pow_cat, qw_col,
        r_col, umin_col, umax_col, inv_cov, q, lambda_)
    assert np.allclose(np.asarray(opt_act), np.asarray(jx_act), atol=2e-4, rtol=2e-4)
    assert np.allclose(np.asarray(opt_state), np.asarray(jx_state), atol=2e-4, rtol=2e-4)
    assert np.allclose(np.asarray(weights), np.asarray(jx_w), atol=2e-5, rtol=1e-3)

    print("KERNEL_OK")
</pallas_src>

<mosaic_0001>
module attributes {stable_mosaic.version = 11 : i64} {
  func.func @_mppi_kernel(%arg0: memref<3xf32, #tpu.memory_space<smem>>, %arg1: memref<16x128xf32, #tpu.memory_space<vmem>>, %arg2: memref<16x1xf32, #tpu.memory_space<vmem>>, %arg3: memref<16x1xf32, #tpu.memory_space<vmem>>, %arg4: memref<16x1xf32, #tpu.memory_space<vmem>>, %arg5: memref<16x1xf32, #tpu.memory_space<vmem>>, %arg6: memref<16x1xf32, #tpu.memory_space<vmem>>, %arg7: memref<32x16xf32, #tpu.memory_space<vmem>>, %arg8: memref<32x1xf32, #tpu.memory_space<vmem>>, %arg9: memref<32x1xf32, #tpu.memory_space<vmem>>, %arg10: memref<16x1xf32, #tpu.memory_space<vmem>>, %arg11: memref<32x1xf32, #tpu.memory_space<vmem>>, %arg12: memref<1x128xf32, #tpu.memory_space<vmem>>) attributes {dimension_semantics = [], scalar_prefetch = 0 : i64, scratch_operands = 0 : i64, tpu.core_type = #tpu.core_type<tc>} {
    %c1 = arith.constant 1 : index
    %0 = memref.load %arg0[%c1] : memref<3xf32, #tpu.memory_space<smem>>
    %c2 = arith.constant 2 : index
    %1 = memref.load %arg0[%c2] : memref<3xf32, #tpu.memory_space<smem>>
    %c0 = arith.constant 0 : index
    %c0_0 = arith.constant 0 : index
    %2 = vector.load %arg2[%c0, %c0_0] : memref<16x1xf32, #tpu.memory_space<vmem>>, vector<16x1xf32>
    %c0_1 = arith.constant 0 : index
    %c0_2 = arith.constant 0 : index
    %3 = vector.load %arg1[%c0_1, %c0_2] : memref<16x128xf32, #tpu.memory_space<vmem>>, vector<16x128xf32>
    %4 = vector.broadcast %2 : vector<16x1xf32> to vector<16x128xf32>
    %5 = arith.addf %4, %3 : vector<16x128xf32>
    %c0_3 = arith.constant 0 : index
    %c0_4 = arith.constant 0 : index
    %6 = vector.load %arg3[%c0_3, %c0_4] : memref<16x1xf32, #tpu.memory_space<vmem>>, vector<16x1xf32>
    %c0_5 = arith.constant 0 : index
    %c0_6 = arith.constant 0 : index
    %7 = vector.load %arg4[%c0_5, %c0_6] : memref<16x1xf32, #tpu.memory_space<vmem>>, vector<16x1xf32>
    %8 = vector.broadcast %6 : vector<16x1xf32> to vector<16x128xf32>
    %9 = arith.maximumf %8, %5 : vector<16x128xf32>
    %10 = vector.broadcast %7 : vector<16x1xf32> to vector<16x128xf32>
    %11 = arith.minimumf %10, %9 : vector<16x128xf32>
    %c0_7 = arith.constant 0 : index
    %c0_8 = arith.constant 0 : index
    %12 = vector.load %arg5[%c0_7, %c0_8] : memref<16x1xf32, #tpu.memory_space<vmem>>, vector<16x1xf32>
    %13 = vector.broadcast %12 : vector<16x1xf32> to vector<16x128xf32>
    %14 = arith.mulf %11, %13 : vector<16x128xf32>
    %c0_9 = arith.constant 0 : index
    %c0_10 = arith.constant 0 : index
    %15 = vector.load %arg6[%c0_9, %c0_10] : memref<16x1xf32, #tpu.memory_space<vmem>>, vector<16x1xf32>
    %16 = vector.broadcast %15 : vector<16x1xf32> to vector<16x128xf32>
    %17 = arith.addf %14, %16 : vector<16x128xf32>
    %18 = arith.mulf %11, %17 : vector<16x128xf32>
    %cst = arith.constant dense<0.000000e+00> : vector<128xf32>
    %19 = vector.multi_reduction <add>, %18, %cst [0] : vector<16x128xf32> to vector<128xf32>
    %20 = vector.shape_cast %19 : vector<128xf32> to vector<1x128xf32>
    %c0_11 = arith.constant 0 : index
    %c0_12 = arith.constant 0 : index
    %21 = vector.load %arg7[%c0_11, %c0_12] : memref<32x16xf32, #tpu.memory_space<vmem>>, vector<32x16xf32>
    %cst_13 = arith.constant dense<0.000000e+00> : vector<32x128xf32>
    %22 = tpu.matmul %21, %11, %cst_13 {dimension_numbers = #tpu.dot_dimension_numbers<[1], [0], [0], [1], [0, 0, 1, 1], [], []>} : vector<32x16xf32>, vector<16x128xf32>, vector<32x128xf32> -> vector<32x128xf32>
    %c0_14 = arith.constant 0 : index
    %c0_15 = arith.constant 0 : index
    %23 = vector.load %arg8[%c0_14, %c0_15] : memref<32x1xf32, #tpu.memory_space<vmem>>, vector<32x1xf32>
    %24 = vector.broadcast %23 : vector<32x1xf32> to vector<32x128xf32>
    %25 = arith.addf %22, %24 : vector<32x128xf32>
    %26 = arith.mulf %25, %25 : vector<32x128xf32>
    %c0_16 = arith.constant 0 : index
    %c0_17 = arith.constant 0 : index
    %27 = vector.load %arg9[%c0_16, %c0_17] : memref<32x1xf32, #tpu.memory_space<vmem>>, vector<32x1xf32>
    %28 = vector.broadcast %27 : vector<32x1xf32> to vector<32x128xf32>
    %29 = arith.mulf %26, %28 : vector<32x128xf32>
    %cst_18 = arith.constant dense<0.000000e+00> : vector<128xf32>
    %30 = vector.multi_reduction <add>, %29, %cst_18 [0] : vector<32x128xf32> to vector<128xf32>
    %31 = vector.shape_cast %30 : vector<128xf32> to vector<1x128xf32>
    %32 = arith.addf %20, %31 : vector<1x128xf32>
    %33 = vector.broadcast %1 : f32 to vector<1x128xf32>
    %34 = arith.addf %32, %33 : vector<1x128xf32>
    %cst_19 = arith.constant 0.000000e+00 : f32
    %35 = vector.broadcast %cst_19 : f32 to vector<1x128xf32>
    %36 = arith.subf %35, %34 : vector<1x128xf32>
    %37 = vector.broadcast %0 : f32 to vector<1x128xf32>
    %38 = arith.mulf %36, %37 : vector<1x128xf32>
    %cst_20 = arith.constant dense<0xFF800000> : vector<1xf32>
    %39 = vector.multi_reduction <maximumf>, %38, %cst_20 [1] : vector<1x128xf32> to vector<1xf32>
    %40 = vector.shape_cast %39 : vector<1xf32> to vector<1x1xf32>
    %41 = vector.broadcast %40 : vector<1x1xf32> to vector<1x128xf32>
    %42 = arith.subf %38, %41 : vector<1x128xf32>
    %43 = math.exp %42 : vector<1x128xf32>
    %cst_21 = arith.constant dense<0.000000e+00> : vector<1xf32>
    %44 = vector.multi_reduction <add>, %43, %cst_21 [1] : vector<1x128xf32> to vector<1xf32>
    %45 = vector.shape_cast %44 : vector<1xf32> to vector<1x1xf32>
    %46 = tpu.reciprocal %45 : vector<1x1xf32> -> vector<1x1xf32>
    %47 = vector.broadcast %46 : vector<1x1xf32> to vector<1x128xf32>
    %48 = arith.mulf %43, %47 : vector<1x128xf32>
    %c0_22 = arith.constant 0 : index
    %c0_23 = arith.constant 0 : index
    %49 = vector.load %arg12[%c0_22, %c0_23] : memref<1x128xf32, #tpu.memory_space<vmem>>, vector<1x128xf32>
    tpu.vector_store %arg12[%c0_22, %c0_23], %48 {strides = array<i32>} : memref<1x128xf32, #tpu.memory_space<vmem>>, vector<1x128xf32>,
    %cst_24 = arith.constant dense<0.000000e+00> : vector<16x1xf32>
    %50 = tpu.matmul %11, %48, %cst_24 {dimension_numbers = #tpu.dot_dimension_numbers<[1], [1], [0], [0], [0, 0, 1, 0], [], []>} : vector<16x128xf32>, vector<1x128xf32>, vector<16x1xf32> -> vector<16x1xf32>
    %c0_25 = arith.constant 0 : index
    %c0_26 = arith.constant 0 : index
    %51 = vector.load %arg10[%c0_25, %c0_26] : memref<16x1xf32, #tpu.memory_space<vmem>>, vector<16x1xf32>
    tpu.vector_store %arg10[%c0_25, %c0_26], %50 {strides = array<i32>} : memref<16x1xf32, #tpu.memory_space<vmem>>, vector<16x1xf32>,
    %c0_27 = arith.constant 0 : index
    %c0_28 = arith.constant 0 : index
    %52 = vector.load %arg7[%c0_27, %c0_28] : memref<32x16xf32, #tpu.memory_space<vmem>>, vector<32x16xf32>
    %cst_29 = arith.constant dense<0.000000e+00> : vector<32x1xf32>
    %53 = tpu.matmul %52, %50, %cst_29 {dimension_numbers = #tpu.dot_dimension_numbers<[1], [0], [0], [1], [0, 0, 1, 1], [], []>} : vector<32x16xf32>, vector<16x1xf32>, vector<32x1xf32> -> vector<32x1xf32>
    %c0_30 = arith.constant 0 : index
    %c0_31 = arith.constant 0 : index
    %54 = vector.load %arg8[%c0_30, %c0_31] : memref<32x1xf32, #tpu.memory_space<vmem>>, vector<32x1xf32>
    %55 = arith.addf %53, %54 : vector<32x1xf32>
    %c0_32 = arith.constant 0 : index
    %c0_33 = arith.constant 0 : index
    %56 = vector.load %arg11[%c0_32, %c0_33] : memref<32x1xf32, #tpu.memory_space<vmem>>, vector<32x1xf32>
    tpu.vector_store %arg11[%c0_32, %c0_33], %55 {strides = array<i32>} : memref<32x1xf32, #tpu.memory_space<vmem>>, vector<32x1xf32>,
    return
  }
}

</mosaic_0001>

<bundles_post_ra>
// kernel: mppi_forward.1
= control target key start
LH: loop header
LB: loop body
LE: loop exit
PB: predicated region body
PF: predicated region fallthrough
CT: control target
= control target key end

     0   :  { %18 = vsyncpa [#allocation4], 0  ;;  %s783_s0 = inlined_call_operand.vmem [shape: f32[3], index: 0, kind: input, shape index: {}]   ;;  %s784_s1 = inlined_call_operand.vmem [shape: f32[16,128], index: 1, kind: input, shape index: {}]   ;;  %s785_s2 = inlined_call_operand.vmem [shape: f32[16,1], index: 2, kind: input, shape index: {}]   ;;  %s786_s3 = inlined_call_operand.vmem [shape: f32[16,1], index: 3, kind: input, shape index: {}]   ;;  %s787_s4 = inlined_call_operand.vmem [shape: f32[16,1], index: 4, kind: input, shape index: {}]   ;;  %s788_s5 = inlined_call_operand.vmem [shape: f32[16,1], index: 5, kind: input, shape index: {}]   ;;  %s789_s6 = inlined_call_operand.vmem [shape: f32[16,1], index: 6, kind: input, shape index: {}]   ;;  %s790_s7 = inlined_call_operand.vmem [shape: f32[32,16], index: 7, kind: input, shape index: {}]   ;;  %s791_s8 = inlined_call_operand.vmem [shape: f32[32,1], index: 8, kind: input, shape index: {}]   ;;  %s792_s9 = inlined_call_operand.vmem [shape: f32[32,1], index: 9, kind: input, shape index: {}]   ;;  %s793_s10 = inlined_call_operand.vmem [shape: f32[16,1], index: 10, kind: output, shape index: {0}]   ;;  %s794_s11 = inlined_call_operand.vmem [shape: f32[32,1], index: 11, kind: output, shape index: {1}]   ;;  %s795_s12 = inlined_call_operand.hbm [shape: f32[1,128], index: 12, kind: output, shape index: {2}]  }
   0x1   :  { %19 = vsyncpa [#allocation3], 0  ;;  %s26_s23 = sshll.u32 %s783_s0, 4  ;;  %s27_s23 = int_to_ptr.vmem [resolvable:$true] %s26_s23 }
   0x2   :  { %s518_s24 = scalar_lea.vmem %s27_s23, 16  ;;  %p523_p1 = scmp.lt.s32.totalorder %s27_s23, %s27_s23 }
   0x3   :  { %p519_p0 = scmp.ne.s32.totalorder %s27_s23, %s518_s24  ;;  %p524_p2 = scmp.lt.s32.totalorder %s518_s24, %s518_s24 }
   0x5   :  { %p525_p3 = por %p524_p2, %p523_p1 }
   0x7   :  { %p526_p4 = pnand %p525_p3, %p519_p0 }
   0x9   :  { %529 = shalt.err (!%p526_p4)
}
   0xa   :  { %s556_s25 = smov [#allocation2]  }
   0xb   :  { %29 = dma.vmem_to_smem %s27_s23, 16, %s556_s25, [#allocation4]  }
   0xc   :  { %552 = dma.done.wait [#allocation4], 16  }
   0xd   :  { %553 = vsyncadd [#allocation4], 4294967280 }
   0xe   :  { %51 = sfence }
   0xf   :  { %v70_v0 = vld [vmem:[%s786_s3] sm:$0xff]  ;;  %v557_v2 = vmov 0   ;;  %v71_v3 = vld [vmem:[%s786_s3 + $0x8] sm:$0xff]  ;;  %v663_v10 = vld [vmem:[%s791_s8 + $0x10] sm:$0xff]  ;;  %vm163_vm0 = vcmask 130048   ;;  %s459_s25 = sld [smem:[#allocation2 + $0x1]] }
  0x10   :  { %v54_v1 = vld [vmem:[%s785_s2] sm:$0xff]  ;;  %513 = vset.pattern.permute.xlu1 %v557_v2  ;;  %512 = vset.pattern.permute.xlu0 %v557_v2  ;;  %v55_v4 = vld [vmem:[%s785_s2 + $0x8] sm:$0xff]  ;;  %v674_v12 = vld [vmem:[%s791_s8 + $0x18] sm:$0xff]  ;;  %vm324_vm1 = vcmask 7168   ;;  %s558_s0 = smov [#allocation5]  }
  0x11   :  { %76 = vperm.xlu1 %513, %v70_v0   ;;  %60 = vperm.xlu0 %512, %v54_v1   ;;  %v73_v5 = vld [vmem:[%s787_s4 + $0x8] sm:$0xff]  ;;  %v72_v6 = vld [vmem:[%s787_s4] sm:$0xff]  ;;  %v268_v18 = vld [vmem:[%s792_s9 + $0x18] sm:$0xff]  ;;  %s446_s30 = sshll.u32 %s558_s0, 4  ;;  %s447_s30 = int_to_ptr.vmem [resolvable:$true] %s446_s30 }
  0x12   :  { %v648_v7 = vld [vmem:[%s791_s8 + $0x8] sm:$0xff]  ;;  %v653_v8 = vld [vmem:[%s791_s8] sm:$0xff]  ;;  %v267_v19 = vld [vmem:[%s792_s9 + $0x10] sm:$0xff]  ;;  %s530_s13 = scalar_lea.vmem %s447_s30, 16  ;;  %s534_s14 = scalar_lea.vmem %s447_s30, 32 }
  0x13   :  { %v98_v9 = vld [vmem:[%s788_s5] sm:$0xff]  ;;  %v99_v13 = vld [vmem:[%s788_s5 + $0x8] sm:$0xff]  ;;  %v718_v36 = vld [vmem:[%s790_s7 + $0x10] sm:$0xff]  ;;  %p531_p5 = scmp.ne.s32.totalorder %s447_s30, %s530_s13  ;;  %p535_p6 = scmp.lt.s32.totalorder %s447_s30, %s447_s30 }
  0x14   :  { %v135_v11 = vld [vmem:[%s790_s7] sm:$0xff]  ;;  %v266_v14 = vld [vmem:[%s792_s9 + $0x8] sm:$0xff]  ;;  %v727_v37 = vld [vmem:[%s790_s7 + $0x18] sm:$0xff]  ;;  %p536_p7 = scmp.lt.s32.totalorder %s534_s14, %s530_s13 }
  0x15   :  { %81 = vperm.xlu1 %513, %v71_v3   ;;  %65 = vperm.xlu0 %512, %v55_v4   ;;  %v265_v15 = vld [vmem:[%s792_s9] sm:$0xff]  ;;  %v113_v16 = vld [vmem:[%s789_s6 + $0x8] sm:$0xff] }
  0x16   :  { %485 = vmatprep.mubr.msk.f32.mxu0 %vm163_vm0, %v135_v11  ;;  %495 = vmatprep.mubr.msk.f32.mxu1 %vm163_vm0, %v135_v11  ;;  %v112_v17 = vld [vmem:[%s789_s6] sm:$0xff]  ;;  %v57_v23 = vld [vmem:[%s784_s1 + $0x8] sm:$0xff]  ;;  %p537_p8 = por %p536_p7, %p535_p6 }
  0x17   :  { %v56_v21 = vld [vmem:[%s784_s1] sm:$0xff]  ;;  %v713_v35 = vld [vmem:[%s790_s7 + $0x8] sm:$0xff]  ;;  %s460_s7 = sld [smem:[#allocation2 + $0x2]] }
  0x18   :  { %p538_p9 = pnand %p537_p8, %p531_p5 }
  0x19   :  { %93 = vperm.xlu1 %513, %v73_v5   ;;  %88 = vperm.xlu0 %512, %v72_v6  }
  0x1d   :  { %150 = vperm.xlu1 %513, %v648_v7   ;;  %145 = vperm.xlu0 %512, %v653_v8  }
  0x21   :  { %102 = vperm.xlu1 %513, %v98_v9   ;;  %155 = vperm.xlu0 %512, %v663_v10  }
  0x25   :  { %160 = vperm.xlu1 %513, %v674_v12   ;;  %107 = vperm.xlu0 %512, %v99_v13  }
  0x29   :  { %276 = vperm.xlu1 %513, %v266_v14   ;;  %271 = vperm.xlu0 %512, %v265_v15  }
  0x2d   :  { %121 = vperm.xlu1 %513, %v113_v16   ;;  %116 = vperm.xlu0 %512, %v112_v17  }
  0x31   :  { %286 = vperm.xlu1 %513, %v268_v18   ;;  %281 = vperm.xlu0 %512, %v267_v19  }
  0x90   :  { %v77_v20 = vpop.permute.xlu1 %76  ;;  %v61_v22 = vpop.permute.xlu0 %60 }
  0x91   :  { %v68_v24 = vadd.f32 %v61_v22, %v56_v21 }
  0x93   :  { %v84_v29 = vmax.f32 %v77_v20, %v68_v24 }
  0x94   :  { %v82_v25 = vpop.permute.xlu1 %81  ;;  %v66_v26 = vpop.permute.xlu0 %65 }
  0x95   :  { %v69_v27 = vadd.f32 %v66_v26, %v57_v23 }
  0x97   :  { %v85_v28 = vmax.f32 %v82_v25, %v69_v27 }
  0x98   :  { %v94_v30 = vpop.permute.xlu1 %93  ;;  %v89_v31 = vpop.permute.xlu0 %88 }
  0x99   :  { %v704_v32 = vmin.f32 %v94_v30, %v85_v28  ;;  %v706_v33 = vmin.f32 %v89_v31, %v84_v29  ;;  %v303_v28 = vstv %s460_s7  ;;  %v306_v31 = vstv %s459_s25 }
  0x9b   :  { %v501_v34 = vpack.c.bf16 %v704_v32, %v706_v33 }
  0x9c   :  { %v151_v38 = vpop.permute.xlu1 %150  ;;  %v146_v39 = vpop.permute.xlu0 %145 }
  0x9d   :  { %502 = vmatprep.subr.bf16.mxu0 %v501_v34 }
  0x9e   :  { %504 = vmatpush3.bf16.msra.mxu0 %v501_v34 }
  0xa0   :  { %v103_v40 = vpop.permute.xlu1 %102  ;;  %v156_v41 = vpop.permute.xlu0 %155 }
  0xa1   :  { %486 = vmatmul.mubr.msk.f32.vlgmr.msra.gmra.mrb[0].mxu0 %vm163_vm0, %v713_v35  ;;  %v110_v48 = vmul.f32 %v103_v40, %v706_v33 }
  0xa2   :  { %488 = vmatprep.mubr.msk.f32.mxu0 %vm163_vm0, %v718_v36 }
  0xa4   :  { %v161_v42 = vpop.permute.xlu1 %160  ;;  %v108_v43 = vpop.permute.xlu0 %107 }
  0xa5   :  { %489 = vmatmul.mubr.msk.f32.gmra.mrb[2].mxu0 %vm163_vm0, %v727_v37  ;;  %v111_v49 = vmul.f32 %v108_v43, %v704_v32 }
  0xa8   :  { %v277_v44 = vpop.permute.xlu1 %276  ;;  %v272_v45 = vpop.permute.xlu0 %271 }
  0xac   :  { %v122_v46 = vpop.permute.xlu1 %121  ;;  %v117_v47 = vpop.permute.xlu0 %116 }
  0xad   :  { %v125_v50 = vadd.f32 %v122_v46, %v111_v49  ;;  %v124_v51 = vadd.f32 %v117_v47, %v110_v48 }
  0xaf   :  { %v127_v52 = vmul.f32 %v125_v50, %v704_v32  ;;  %v126_v53 = vmul.f32 %v124_v51, %v706_v33 }
  0xb0   :  { %v282_v9 = vpop.permute.xlu0 %281  ;;  %v287_v14 = vpop.permute.xlu1 %286 }
  0xb1   :  { %v128_v57 = vadd.f32 %v127_v52, %v126_v53 }
  0xb3   :  { %v129_v1 = vrot.slane %v128_v57, 4 }
  0xb5   :  { %v130_v11 = vadd.f32 %v129_v1, %v128_v57 }
  0xb7   :  { %v131_v17 = vrot.slane %v130_v11, 2 }
  0xb9   :  { %v132_v20 = vadd.f32 %v131_v17, %v130_v11 }
  0xbb   :  { %v133_v23 = vrot.slane %v132_v20, 1 }
  0xbd   :  { %v134_v26 = vadd.f32 %v133_v23, %v132_v20 }
 0x174   :  { %v487_v54 = vpop.f32.mrb[0].mxu0 }
 0x175   :  { %v248_v55 = vadd.f32 %v487_v54, %v151_v38  ;;  %v242_v56 = vpop.f32.mrb[1].mxu0 }
 0x176   :  { %v243_v58 = vadd.f32 %v242_v56, %v146_v39 }
 0x177   :  { %v262_v59 = vmul.f32 %v248_v55, %v248_v55 }
 0x178   :  { %v261_v60 = vmul.f32 %v243_v58, %v243_v58  ;;  %v490_v61 = vpop.f32.mrb[2].mxu0 }
 0x179   :  { %v290_v62 = vmul.f32 %v277_v44, %v262_v59  ;;  %v258_v63 = vadd.f32 %v490_v61, %v161_v42  ;;  %v252_v0 = vpop.f32.mrb[3].mxu0 }
 0x17a   :  { %v289_v2 = vmul.f32 %v272_v45, %v261_v60  ;;  %v253_v3 = vadd.f32 %v252_v0, %v156_v41 }
 0x17b   :  { %v264_v5 = vmul.f32 %v258_v63, %v258_v63 }
 0x17c   :  { %v293_v4 = vadd.f32 %v290_v62, %v289_v2  ;;  %v263_v6 = vmul.f32 %v253_v3, %v253_v3 }
 0x17d   :  { %v292_v15 = vmul.f32 %v287_v14, %v264_v5 }
 0x17e   :  { %v291_v13 = vmul.f32 %v282_v9, %v263_v6 }
 0x180   :  { %v294_v16 = vadd.f32 %v293_v4, %v291_v13 }
 0x182   :  { %v295_v18 = vadd.f32 %v294_v16, %v292_v15 }
 0x184   :  { %v296_v19 = vrot.slane %v295_v18, 4 }
 0x186   :  { %v297_v21 = vadd.f32 %v296_v19, %v295_v18 }
 0x188   :  { %v298_v22 = vrot.slane %v297_v21, 2 }
 0x18a   :  { %v299_v24 = vadd.f32 %v298_v22, %v297_v21 }
 0x18c   :  { %v300_v25 = vrot.slane %v299_v24, 1 }
 0x18e   :  { %v301_v27 = vadd.f32 %v300_v25, %v299_v24 }
 0x190   :  { %v302_v29 = vadd.f32 %v301_v27, %v134_v26 }
 0x192   :  { %v304_v30 = vadd.f32 %v303_v28, %v302_v29 }
 0x194   :  { %v305_v34 = vsub.f32 0.0, %v304_v30 }
 0x196   :  { %v307_v38 = vmul.f32 %v306_v31, %v305_v34 }
 0x198   :  { %308 = vmax.xlane.f32.xlu0 %v307_v38 }
 0x225   :  { %v309_v39 = vpop.xlane.xlu0 %308 }
 0x226   :  { %v310_v40 = vsub.f32 %v307_v38, %v309_v39 }
 0x228   :  { %v311_v41 = vmul.f32 1.442695, %v310_v40 }
 0x22a   :  { %514 = vpow2.f32 %v311_v41 }
 0x234   :  { %v515_v42 = vpop.eup %514 }
 0x235   :  { %313 = vadd.xlane.f32.xlu1 %v515_v42 }
 0x2c2   :  { %v314_v43 = vpop.xlane.xlu1 %313 }
 0x2c3   :  { %516 = vrcp.f32 %v314_v43 }
 0x2cd   :  { %v517_v44 = vpop.eup %516 }
 0x2ce   :  { %v316_v45 = vmul.f32 %v517_v44, %v515_v42 }
 0x2d0   :  { %v318_v46 = vmul.f32 %v316_v45, %v706_v33  ;;  %317 = vst [vmem:[#allocation5] sm:$0x1] %v316_v45  ;;  %v319_v47 = vmul.f32 %v316_v45, %v704_v32 }
 0x2d2   :  { %320 = vadd.xlane.f32.xlu0 %v318_v46 }
 0x2d6   :  { %322 = vadd.xlane.f32.xlu0 %v319_v47 }
 0x35f   :  { %v321_v48 = vpop.xlane.xlu0 %320 }
 0x360   :  { %325 = vst.msk [vmem:[%s793_s10] sm:$0xff] %vm324_vm1, %v321_v48 }
 0x363   :  { %v323_v49 = vpop.xlane.xlu0 %322 }
 0x364   :  { %326 = vst.msk [vmem:[%s793_s10 + $0x8] sm:$0xff] %vm324_vm1, %v323_v49  ;;  %v505_v50 = vpack.c.bf16 %v323_v49, %v321_v48 }
 0x366   :  { %506 = vmatprep.subr.bf16.mxu1 %v505_v50 }
 0x367   :  { %508 = vmatpush3.bf16.msra.mxu1 %v505_v50 }
 0x36a   :  { %496 = vmatmul.mubr.msk.f32.vlgmr.msra.gmra.mrb[0].mxu1 %vm163_vm0, %v713_v35 }
 0x36b   :  { %498 = vmatprep.mubr.msk.f32.mxu1 %vm163_vm0, %v718_v36 }
 0x36e   :  { %499 = vmatmul.mubr.msk.f32.gmra.mrb[2].mxu1 %vm163_vm0, %v727_v37 }
 0x36f   :  { %541 = shalt.err (!%p538_p9)
}
 0x370   :  { %s542_s8 = scalar_lea.hbm %s795_s12, 16 }
 0x371   :  { %p543_p10 = scmp.ne.s32.totalorder %s795_s12, %s542_s8  ;;  %p546_p11 = scmp.lt.u32.totalorder %s542_s8, %s795_s12 }
 0x373   :  { %p548_p12 = pnand %p546_p11, %p543_p10 }
 0x375   :  { %551 = shalt.err (!%p548_p12)
}
 0x376   :  { %449 = dma.vmem_to_hbm [thread:$0]  %s447_s30, 16, %s795_s12, [#allocation3]  }
 0x43d   :  { %v497_v32 = vpop.f32.mrb[0].mxu1 }
 0x43e   :  { %v419_v33 = vadd.f32 %v497_v32, %v648_v7  ;;  %v413_v35 = vpop.f32.mrb[1].mxu1 }
 0x43f   :  { %v414_v36 = vadd.f32 %v413_v35, %v653_v8 }
 0x440   :  { %433 = vst.msk [vmem:[%s794_s11 + $0x8] sm:$0xff] %vm324_vm1, %v419_v33 }
 0x441   :  { %432 = vst.msk [vmem:[%s794_s11] sm:$0xff] %vm324_vm1, %v414_v36  ;;  %v500_v37 = vpop.f32.mrb[2].mxu1 }
 0x442   :  { %v429_v51 = vadd.f32 %v500_v37, %v674_v12  ;;  %v423_v52 = vpop.f32.mrb[3].mxu1 }
 0x443   :  { %v424_v53 = vadd.f32 %v423_v52, %v663_v10 }
 0x444   :  { %435 = vst.msk [vmem:[%s794_s11 + $0x18] sm:$0xff] %vm324_vm1, %v429_v51 }
 0x445   :  { %434 = vst.msk [vmem:[%s794_s11 + $0x10] sm:$0xff] %vm324_vm1, %v424_v53 }
 0x446   :  { %554 = dma.done.wait [#allocation3], 16  }
 0x447   :  { %555 = vsyncadd [#allocation3], 4294967280 }
 0x448   :  { %457 = vsyncpa [#allocation3], 1 }
 0x449   :  { %458 = vsyncpa [#allocation4], 1 }

</bundles_post_ra>
